<compile_context>
chip_gen: v6e
topology: v6e:2x2x1
jax: 0.10.0
libtpu: 0.0.40
codegen_flags: <defaults>
</compile_context>

<pallas_src>
import jax
import jax.numpy as jnp
from jax.experimental import pallas as pl
from jax.experimental.pallas import tpu as pltpu


# ----------------------------- model dimensions -----------------------------
B = 2              # demo batch
SEQ = 8            # seq_len
FEA = 4            # fea_dim
D_IN = SEQ * FEA   # flattened input features (32)
HID = 32           # encoder/decoder hidden width
LATENT = 2         # encoder.latent_dim
REG = 32           # config['regression_dims']
DROPOUT_P = 0.5    # config['dropout_regressor'] (identity in eval mode)

LANE = 128         # TPU lane width
TILE_B = 128       # rows per grid step (batch tile)

# ---------------- packed parameter slab layout (rows x 128 lanes) ------------
R_WE1 = 0                     # [D_IN, HID]        encoder layer 1 weight
R_BE1 = R_WE1 + D_IN          # [1, HID]           encoder layer 1 bias
R_WML = R_BE1 + 1             # [HID, 2*LATENT]    (wmu | wlv) fused
R_BML = R_WML + HID           # [1, 2*LATENT]      (bmu | blv) fused
R_WZH = R_BML + 1             # [LATENT, REG+HID]  (wr1 | wd1) fused
R_BZH = R_WZH + LATENT        # [1, REG+HID]       (br1 | bd1) fused
R_WR2 = R_BZH + 1             # [1, REG]           final RUL projection (wr2^T)
R_BR2 = R_WR2 + 1             # [1, 1]             final RUL bias
R_WD2 = R_BR2 + 1             # [HID, D_IN]        decoder output weight
R_BD2 = R_WD2 + HID           # [1, D_IN]          decoder output bias
P_ROWS = ((R_BD2 + 1 + 7) // 8) * 8   # = 104, sublane-aligned

# ---------------- packed output layout (lane offsets in the [B,128] tile) ----
O_XHAT = 0                    # cols [0, D_IN)
O_Y = O_XHAT + D_IN           # 1 col
O_Z = O_Y + 1                 # LATENT cols
O_MEAN = O_Z + LATENT         # LATENT cols
O_LVAR = O_MEAN + LATENT      # LATENT cols
O_USED = O_LVAR + LATENT      # = 39 <= 128
assert O_USED <= LANE and D_IN + LATENT <= LANE


# ------------------------------ Pallas kernel -------------------------------
def tshae_kernel(xe_ref, p_ref, out_ref):
    # xe_ref: [TILE_B, 128]  cols [0,D_IN)=x_flat, [D_IN,D_IN+LATENT)=eps
    # p_ref:  [P_ROWS, 128]  packed parameter slab (resident across the grid)
    # out_ref:[TILE_B, 128]  packed outputs
    xe = xe_ref[...]
    x = xe[:, :D_IN]                            # [TB, D_IN]
    eps = xe[:, D_IN:D_IN + LATENT]             # [TB, LATENT]

    # ---- carve parameters out of the slab (static, cheap VMEM slices) ----
    we1 = p_ref[R_WE1:R_WE1 + D_IN, :HID]
    be1 = p_ref[R_BE1:R_BE1 + 1, :HID]
    w_ml = p_ref[R_WML:R_WML + HID, :2 * LATENT]
    b_ml = p_ref[R_BML:R_BML + 1, :2 * LATENT]
    w_zh = p_ref[R_WZH:R_WZH + LATENT, :REG + HID]
    b_zh = p_ref[R_BZH:R_BZH + 1, :REG + HID]
    wr2 = p_ref[R_WR2:R_WR2 + 1, :REG]
    br2 = p_ref[R_BR2:R_BR2 + 1, 0:1]
    wd2 = p_ref[R_WD2:R_WD2 + HID, :D_IN]
    bd2 = p_ref[R_BD2:R_BD2 + 1, :D_IN]

    # ---- encoder: MLP -> (mean, log_var) via one fused dot, reparameterize ----
    h = jnp.tanh(jnp.dot(x, we1, preferred_element_type=jnp.float32) + be1)
    ml = jnp.dot(h, w_ml, preferred_element_type=jnp.float32) + b_ml
    mean = ml[:, :LATENT]
    log_var = ml[:, LATENT:2 * LATENT]
    z = mean + eps * jnp.exp(0.5 * log_var)      # [TB, LATENT]

    # ---- fused z-consuming matmul: regressor hidden | decoder hidden ----
    rh = jnp.tanh(jnp.dot(z, w_zh, preferred_element_type=jnp.float32) + b_zh)
    r = rh[:, :REG]                              # regressor hidden (post-tanh)
    hd = rh[:, REG:REG + HID]                    # decoder hidden   (post-tanh)

    # Dropout(p) in eval mode is identity (no masking, no scaling).
    # Final RUL projection (N=1): VPU multiply + lane reduce instead of MXU.
    y = jnp.sum(r * wr2, axis=-1, keepdims=True) + br2          # [TB, 1]

    # ---- decoder output layer ----
    xh = jnp.dot(hd, wd2, preferred_element_type=jnp.float32) + bd2  # [TB, D_IN]

    # ---- single lane-dense packed store ----
    tb = xe.shape[0]
    pad = jnp.zeros((tb, LANE - O_USED), jnp.float32)
    out_ref[...] = jnp.concatenate([xh, y, z, mean, log_var, pad], axis=-1)


# ------------------------------ JAX wrapper ---------------------------------
def init_params(key):
    """Deterministic synthetic parameters (shapes implied by the module)."""
    ks = jax.random.split(key, 8)
    scale = 0.1
    return {
        # encoder
        "we1": scale * jax.random.normal(ks[0], (D_IN, HID), jnp.float32),
        "be1": jnp.zeros((HID,), jnp.float32),
        "wmu": scale * jax.random.normal(ks[1], (HID, LATENT), jnp.float32),
        "bmu": jnp.zeros((LATENT,), jnp.float32),
        "wlv": scale * jax.random.normal(ks[2], (HID, LATENT), jnp.float32),
        "blv": jnp.zeros((LATENT,), jnp.float32),
        # regressor
        "wr1": scale * jax.random.normal(ks[3], (LATENT, REG), jnp.float32),
        "br1": jnp.zeros((REG,), jnp.float32),
        "wr2": scale * jax.random.normal(ks[4], (REG, 1), jnp.float32),
        "br2": jnp.zeros((1,), jnp.float32),
        # decoder
        "wd1": scale * jax.random.normal(ks[5], (LATENT, HID), jnp.float32),
        "bd1": jnp.zeros((HID,), jnp.float32),
        "wd2": scale * jax.random.normal(ks[6], (HID, D_IN), jnp.float32),
        "bd2": jnp.zeros((D_IN,), jnp.float32),
    }


def pack_params(p):
    """Pack all weights/biases into one [P_ROWS, 128] f32 slab (one DMA)."""
    slab = jnp.zeros((P_ROWS, LANE), jnp.float32)
    slab = slab.at[R_WE1:R_WE1 + D_IN, :HID].set(p["we1"])
    slab = slab.at[R_BE1, :HID].set(p["be1"])
    slab = slab.at[R_WML:R_WML + HID, :2 * LATENT].set(
        jnp.concatenate([p["wmu"], p["wlv"]], axis=1))
    slab = slab.at[R_BML, :2 * LATENT].set(
        jnp.concatenate([p["bmu"], p["blv"]], axis=0))
    slab = slab.at[R_WZH:R_WZH + LATENT, :REG + HID].set(
        jnp.concatenate([p["wr1"], p["wd1"]], axis=1))
    slab = slab.at[R_BZH, :REG + HID].set(
        jnp.concatenate([p["br1"], p["bd1"]], axis=0))
    slab = slab.at[R_WR2, :REG].set(p["wr2"][:, 0])
    slab = slab.at[R_BR2, 0].set(p["br2"][0])
    slab = slab.at[R_WD2:R_WD2 + HID, :D_IN].set(p["wd2"])
    slab = slab.at[R_BD2, :D_IN].set(p["bd2"])
    return slab


def tshae_forward(param_slab, x, noise_key):
    """x: [B, seq_len, fea_dim] -> (y_hat, z, mean, log_var, x_hat, z_pos, z_neg)."""
    b, s, f = x.shape
    assert s * f == D_IN
    x_flat = x.reshape(b, s * f)

    k_eps, k_neg = jax.random.split(noise_key)
    eps = jax.random.normal(k_eps, (b, LATENT), jnp.float32)    # reparam noise
    z_neg = jax.random.normal(k_neg, (b, LATENT), jnp.float32)  # torch.randn_like(z)

    # pack x and eps into one lane-dense, batch-padded input slab
    b_pad = ((b + TILE_B - 1) // TILE_B) * TILE_B
    xe = jnp.zeros((b_pad, LANE), jnp.float32)
    xe = xe.at[:b, :D_IN].set(x_flat)
    xe = xe.at[:b, D_IN:D_IN + LATENT].set(eps)

    out = pl.pallas_call(
        tshae_kernel,
        out_shape=jax.ShapeDtypeStruct((b_pad, LANE), jnp.float32),
        grid=(b_pad // TILE_B,),
        in_specs=[
            pl.BlockSpec((TILE_B, LANE), lambda i: (i, 0)),   # batch-tiled x|eps
            pl.BlockSpec((P_ROWS, LANE), lambda i: (0, 0)),   # resident params
        ],
        out_specs=pl.BlockSpec((TILE_B, LANE), lambda i: (i, 0)),
        compiler_params=pltpu.CompilerParams(
            dimension_semantics=("parallel",)),               # megacore on v7x
    )(xe, param_slab)

    x_hat = out[:b, O_XHAT:O_XHAT + D_IN].reshape(b, s, f)
    y_hat = out[:b, O_Y:O_Y + 1]
    z = out[:b, O_Z:O_Z + LATENT]
    mean = out[:b, O_MEAN:O_MEAN + LATENT]
    log_var = out[:b, O_LVAR:O_LVAR + LATENT]
    z_pos = z
    return y_hat, z, mean, log_var, x_hat, z_pos, z_neg


def tshae_reference(params, x, noise_key):
    """Pure-JAX reference of the same modeled TSHAE forward."""
    b, s, f = x.shape
    x_flat = x.reshape(b, s * f)
    k_eps, k_neg = jax.random.split(noise_key)
    eps = jax.random.normal(k_eps, (b, LATENT), jnp.float32)
    z_neg = jax.random.normal(k_neg, (b, LATENT), jnp.float32)
    h = jnp.tanh(x_flat @ params["we1"] + params["be1"])
    mean = h @ params["wmu"] + params["bmu"]
    log_var = h @ params["wlv"] + params["blv"]
    z = mean + eps * jnp.exp(0.5 * log_var)
    r = jnp.tanh(z @ params["wr1"] + params["br1"])
    y = r @ params["wr2"] + params["br2"]
    hd = jnp.tanh(z @ params["wd1"] + params["bd1"])
    xh = (hd @ params["wd2"] + params["bd2"]).reshape(b, s, f)
    return y, z, mean, log_var, xh, z, z_neg


if __name__ == "__main__":
    key = jax.random.PRNGKey(0)
    k_param, k_x, k_noise = jax.random.split(key, 3)

    params = init_params(k_param)
    param_slab = pack_params(params)
    x = jax.random.normal(k_x, (B, SEQ, FEA), jnp.float32)

    fwd = jax.jit(tshae_forward)
    outs = jax.block_until_ready(fwd(param_slab, x, k_noise))
    y_hat, z, mean, log_var, x_hat, z_pos, z_neg = outs

    assert y_hat.shape == (B, 1)
    assert z.shape == (B, LATENT) and mean.shape == (B, LATENT)
    assert log_var.shape == (B, LATENT)
    assert x_hat.shape == (B, SEQ, FEA)
    assert z_pos.shape == (B, LATENT) and z_neg.shape == (B, LATENT)
    for o in outs:
        assert bool(jnp.all(jnp.isfinite(o)))

    # numerical sanity check vs pure-JAX reference (same modeled VAE blocks)
    refs = tshae_reference(params, x, k_noise)
    names = ("y_hat", "z", "mean", "log_var", "x_hat", "z_pos", "z_neg")
    for name, a, r in zip(names, outs, refs):
        assert jnp.allclose(a, r, rtol=2e-2, atol=2e-2), name

    # exercise the multi-tile grid path (batch > TILE_B after padding)
    x_big = jax.random.normal(k_x, (300, SEQ, FEA), jnp.float32)
    outs_big = jax.block_until_ready(fwd(param_slab, x_big, k_noise))
    assert outs_big[0].shape == (300, 1)
    assert outs_big[4].shape == (300, SEQ, FEA)
    assert bool(jnp.all(jnp.isfinite(outs_big[4])))

    # TODO(synk): encoder/decoder internals are injected nn.Modules in the
    # reference (not provided); modeled here as Linear+Tanh MLP VAE blocks
    # honoring the documented I/O contract. Dropout is eval-mode (identity).
    print("KERNEL_OK")
</pallas_src>

<mosaic_0001>
module attributes {stable_mosaic.version = 11 : i64} {
  func.func @tshae_kernel(%arg0: i32, %arg1: memref<128x128xf32, #tpu.memory_space<vmem>>, %arg2: memref<104x128xf32, #tpu.memory_space<vmem>>, %arg3: memref<128x128xf32, #tpu.memory_space<vmem>>) attributes {dimension_semantics = [#tpu.dimension_semantics<parallel>], iteration_bounds = array<i64: 1>, scalar_prefetch = 0 : i64, scratch_operands = 0 : i64, tpu.core_type = #tpu.core_type<tc>, window_params = [{transform_indices = @transform_0, window_bounds = array<i64: 128, 128>}, {pipeline_mode = #tpu.pipeline_mode<synchronous>, transform_indices = @transform_1, window_bounds = array<i64: 104, 128>}, {transform_indices = @transform_2, window_bounds = array<i64: 128, 128>}]} {
    %c0 = arith.constant 0 : index
    %c0_0 = arith.constant 0 : index
    %0 = vector.load %arg1[%c0, %c0_0] : memref<128x128xf32, #tpu.memory_space<vmem>>, vector<128x128xf32>
    %1 = vector.extract_strided_slice %0 {offsets = [0, 0], sizes = [128, 32], strides = [1, 1]} : vector<128x128xf32> to vector<128x32xf32>
    %2 = vector.extract_strided_slice %0 {offsets = [0, 32], sizes = [128, 2], strides = [1, 1]} : vector<128x128xf32> to vector<128x2xf32>
    %c0_1 = arith.constant 0 : index
    %c0_2 = arith.constant 0 : index
    %3 = vector.load %arg2[%c0_1, %c0_2] : memref<104x128xf32, #tpu.memory_space<vmem>>, vector<32x32xf32>
    %c32 = arith.constant 32 : index
    %c0_3 = arith.constant 0 : index
    %4 = vector.load %arg2[%c32, %c0_3] : memref<104x128xf32, #tpu.memory_space<vmem>>, vector<1x32xf32>
    %c33 = arith.constant 33 : index
    %c0_4 = arith.constant 0 : index
    %5 = vector.load %arg2[%c33, %c0_4] : memref<104x128xf32, #tpu.memory_space<vmem>>, vector<32x4xf32>
    %c65 = arith.constant 65 : index
    %c0_5 = arith.constant 0 : index
    %6 = vector.load %arg2[%c65, %c0_5] : memref<104x128xf32, #tpu.memory_space<vmem>>, vector<1x4xf32>
    %c66 = arith.constant 66 : index
    %c0_6 = arith.constant 0 : index
    %7 = vector.load %arg2[%c66, %c0_6] : memref<104x128xf32, #tpu.memory_space<vmem>>, vector<2x64xf32>
    %c68 = arith.constant 68 : index
    %c0_7 = arith.constant 0 : index
    %8 = vector.load %arg2[%c68, %c0_7] : memref<104x128xf32, #tpu.memory_space<vmem>>, vector<1x64xf32>
    %c69 = arith.constant 69 : index
    %c0_8 = arith.constant 0 : index
    %9 = vector.load %arg2[%c69, %c0_8] : memref<104x128xf32, #tpu.memory_space<vmem>>, vector<1x32xf32>
    %c70 = arith.constant 70 : index
    %c0_9 = arith.constant 0 : index
    %10 = vector.load %arg2[%c70, %c0_9] : memref<104x128xf32, #tpu.memory_space<vmem>>, vector<1x1xf32>
    %c71 = arith.constant 71 : index
    %c0_10 = arith.constant 0 : index
    %11 = vector.load %arg2[%c71, %c0_10] : memref<104x128xf32, #tpu.memory_space<vmem>>, vector<32x32xf32>
    %c103 = arith.constant 103 : index
    %c0_11 = arith.constant 0 : index
    %12 = vector.load %arg2[%c103, %c0_11] : memref<104x128xf32, #tpu.memory_space<vmem>>, vector<1x32xf32>
    %cst = arith.constant dense<0.000000e+00> : vector<128x32xf32>
    %13 = tpu.matmul %1, %3, %cst {dimension_numbers = #tpu.dot_dimension_numbers<[1], [0], [0], [1], [0, 0, 1, 1], [], []>} : vector<128x32xf32>, vector<32x32xf32>, vector<128x32xf32> -> vector<128x32xf32>
    %14 = vector.broadcast %4 : vector<1x32xf32> to vector<128x32xf32>
    %15 = arith.addf %13, %14 : vector<128x32xf32>
    %16 = math.tanh %15 : vector<128x32xf32>
    %cst_12 = arith.constant dense<0.000000e+00> : vector<128x4xf32>
    %17 = tpu.matmul %16, %5, %cst_12 {dimension_numbers = #tpu.dot_dimension_numbers<[1], [0], [0], [1], [0, 0, 1, 1], [], []>} : vector<128x32xf32>, vector<32x4xf32>, vector<128x4xf32> -> vector<128x4xf32>
    %18 = vector.broadcast %6 : vector<1x4xf32> to vector<128x4xf32>
    %19 = arith.addf %17, %18 : vector<128x4xf32>
    %20 = vector.extract_strided_slice %19 {offsets = [0, 0], sizes = [128, 2], strides = [1, 1]} : vector<128x4xf32> to vector<128x2xf32>
    %21 = vector.extract_strided_slice %19 {offsets = [0, 2], sizes = [128, 2], strides = [1, 1]} : vector<128x4xf32> to vector<128x2xf32>
    %cst_13 = arith.constant 5.000000e-01 : f32
    %22 = vector.broadcast %cst_13 : f32 to vector<128x2xf32>
    %23 = arith.mulf %22, %21 : vector<128x2xf32>
    %24 = math.exp %23 : vector<128x2xf32>
    %25 = arith.mulf %2, %24 : vector<128x2xf32>
    %26 = arith.addf %20, %25 : vector<128x2xf32>
    %cst_14 = arith.constant dense<0.000000e+00> : vector<128x64xf32>
    %27 = tpu.matmul %26, %7, %cst_14 {dimension_numbers = #tpu.dot_dimension_numbers<[1], [0], [0], [1], [0, 0, 1, 1], [], []>} : vector<128x2xf32>, vector<2x64xf32>, vector<128x64xf32> -> vector<128x64xf32>
    %28 = vector.broadcast %8 : vector<1x64xf32> to vector<128x64xf32>
    %29 = arith.addf %27, %28 : vector<128x64xf32>
    %30 = math.tanh %29 : vector<128x64xf32>
    %31 = vector.extract_strided_slice %30 {offsets = [0, 0], sizes = [128, 32], strides = [1, 1]} : vector<128x64xf32> to vector<128x32xf32>
    %32 = vector.extract_strided_slice %30 {offsets = [0, 32], sizes = [128, 32], strides = [1, 1]} : vector<128x64xf32> to vector<128x32xf32>
    %33 = vector.broadcast %9 : vector<1x32xf32> to vector<128x32xf32>
    %34 = arith.mulf %31, %33 : vector<128x32xf32>
    %cst_15 = arith.constant dense<0.000000e+00> : vector<128xf32>
    %35 = vector.multi_reduction <add>, %34, %cst_15 [1] : vector<128x32xf32> to vector<128xf32>
    %36 = vector.shape_cast %35 : vector<128xf32> to vector<128x1xf32>
    %37 = vector.broadcast %10 : vector<1x1xf32> to vector<128x1xf32>
    %38 = arith.addf %36, %37 : vector<128x1xf32>
    %cst_16 = arith.constant dense<0.000000e+00> : vector<128x32xf32>
    %39 = tpu.matmul %32, %11, %cst_16 {dimension_numbers = #tpu.dot_dimension_numbers<[1], [0], [0], [1], [0, 0, 1, 1], [], []>} : vector<128x32xf32>, vector<32x32xf32>, vector<128x32xf32> -> vector<128x32xf32>
    %40 = vector.broadcast %12 : vector<1x32xf32> to vector<128x32xf32>
    %41 = arith.addf %39, %40 : vector<128x32xf32>
    %cst_17 = arith.constant 0.000000e+00 : f32
    %42 = vector.broadcast %cst_17 : f32 to vector<128x89xf32>
    %43 = tpu.concatenate %41, %38, %26, %20, %21, %42 in 1 : vector<128x32xf32>, vector<128x1xf32>, vector<128x2xf32>, vector<128x2xf32>, vector<128x2xf32>, vector<128x89xf32> -> vector<128x128xf32>
    %c0_18 = arith.constant 0 : index
    %c0_19 = arith.constant 0 : index
    %44 = vector.load %arg3[%c0_18, %c0_19] : memref<128x128xf32, #tpu.memory_space<vmem>>, vector<128x128xf32>
    tpu.vector_store %arg3[%c0_18, %c0_19], %43 {strides = array<i32>} : memref<128x128xf32, #tpu.memory_space<vmem>>, vector<128x128xf32>,
    return
  }
  func.func @transform_0(%arg0: i32) -> (i32, i32) {
    %c0_i32 = arith.constant 0 : i32
    %c0_i32_0 = arith.constant 0 : i32
    return %arg0, %c0_i32 : i32, i32
  }
  func.func @transform_1(%arg0: i32) -> (i32, i32) {
    %c0_i32 = arith.constant 0 : i32
    %c0_i32_0 = arith.constant 0 : i32
    %c0_i32_1 = arith.constant 0 : i32
    return %c0_i32, %c0_i32_0 : i32, i32
  }
  func.func @transform_2(%arg0: i32) -> (i32, i32) {
    %c0_i32 = arith.constant 0 : i32
    %c0_i32_0 = arith.constant 0 : i32
    return %arg0, %c0_i32 : i32, i32
  }
}

</mosaic_0001>

<bundles_post_ra>
// kernel: tshae_forward.3
= control target key start
LH: loop header
LB: loop body
LE: loop exit
PB: predicated region body
PF: predicated region fallthrough
CT: control target
= control target key end

     0   :  { %vm50_vm0 = vcmask 261120   ;;  %s1851_s4 = smov 30   ;;  %vm718_vm1 = vcmask 1041408   ;;  %s1852_s7 = smov 96   ;;  %vm669_vm2 = vcmask 15360   ;;  %vm1392_vm3 = vcmask 269312   ;;  %s2689_s1 = inlined_call_operand.vmem [shape: f32[104,128], index: 1, kind: input, shape index: {}]   ;;  %s2690_s0 = inlined_call_operand.vmem [shape: f32[128,128], index: 0, kind: input, shape index: {}]   ;;  %s2691_s2 = inlined_call_operand.vmem [shape: f32[128,128], index: 2, kind: output, shape index: {}]  }
   0x1   :  { %v30_v0 = vld [vmem:[%s2689_s1 + $0x18] sm:$0xff]  ;;  %v29_v1 = vld [vmem:[%s2689_s1 + $0x10] sm:$0xff]  ;;  %v1880_v2 = vld [vmem:[%s2690_s0] sm:$0xff]  ;;  %s1853_s20 = smov 33   ;;  %s1854_s21 = smov 35   ;;  %vm1409_vm4 = vcmask 285696  }
   0x2   :  { %1628 = vmatprep.subr.mxu0 %v30_v0  ;;  %v28_v3 = vld [vmem:[%s2689_s1 + $0x8] sm:$0xff]  ;;  %1636 = vmatprep.mubr.msk.f32.mxu0 %vm50_vm0, %v1880_v2  ;;  %v27_v4 = vld [vmem:[%s2689_s1] sm:$0xff]  ;;  %v1898_v6 = vld [vmem:[%s2690_s0 + $0x10] sm:$0xff]  ;;  %s1855_s24 = smov 32   ;;  %vm1426_vm5 = vcmask 302080   ;;  %vm1443_vm6 = vcmask 318464  }
   0x3   :  { %1629 = vmatpush3.msra.mxu0 %v30_v0  ;;  %v1893_v5 = vld [vmem:[%s2690_s0 + $0x8] sm:$0xff]  ;;  %v1907_v7 = vld [vmem:[%s2690_s0 + $0x18] sm:$0xff]  ;;  %v1912_v8 = vld [vmem:[%s2690_s0 + $0x20] sm:$0xff] }
   0x4   :  { %1630 = vmatprep.subr.mxu0 %v29_v1  ;;  %v1921_v9 = vld [vmem:[%s2690_s0 + $0x28] sm:$0xff]  ;;  %v1926_v10 = vld [vmem:[%s2690_s0 + $0x30] sm:$0xff]  ;;  %v1935_v11 = vld [vmem:[%s2690_s0 + $0x38] sm:$0xff] }
   0x5   :  { %1631 = vmatpush3.msra.mxu0 %v29_v1  ;;  %v1940_v12 = vld [vmem:[%s2690_s0 + $0x40] sm:$0xff]  ;;  %v1949_v13 = vld [vmem:[%s2690_s0 + $0x48] sm:$0xff]  ;;  %v1954_v14 = vld [vmem:[%s2690_s0 + $0x50] sm:$0xff] }
   0x6   :  { %1632 = vmatprep.subr.mxu0 %v28_v3  ;;  %v1963_v15 = vld [vmem:[%s2690_s0 + $0x58] sm:$0xff]  ;;  %v1968_v16 = vld [vmem:[%s2690_s0 + $0x60] sm:$0xff]  ;;  %v1977_v17 = vld [vmem:[%s2690_s0 + $0x68] sm:$0xff] }
   0x7   :  { %1633 = vmatpush3.msra.mxu0 %v28_v3  ;;  %v1982_v18 = vld [vmem:[%s2690_s0 + $0x70] sm:$0xff]  ;;  %v1991_v19 = vld [vmem:[%s2690_s0 + $0x78] sm:$0xff]  ;;  %v32_v23 = vld [vmem:[%s2689_s1 + $0x21] sm:$0xff] }
   0x8   :  { %1634 = vmatprep.subr.mxu0 %v27_v4  ;;  %v35_v20 = vld [vmem:[%s2689_s1 + $0x39] sm:$0xff]  ;;  %v34_v21 = vld [vmem:[%s2689_s1 + $0x31] sm:$0xff]  ;;  %v33_v22 = vld [vmem:[%s2689_s1 + $0x29] sm:$0xff] }
   0x9   :  { %1635 = vmatpush3.msra.mxu0 %v27_v4  ;;  %1660 = vmatprep.subr.mxu1 %v35_v20  ;;  %v1480_v24 = vld [vmem:[%s2689_s1 + $0x20] ss:$0 sm:$0xff] }
   0xa   :  { %1637 = vmatmul.mubr.msk.f32.vlgmr.msra.gmra.mxu0 %vm50_vm0, %v1893_v5  ;;  %1661 = vmatpush3.msra.mxu1 %v35_v20 }
   0xb   :  { %1639 = vmatprep.mubr.msk.f32.mxu0 %vm50_vm0, %v1898_v6  ;;  %1662 = vmatprep.subr.mxu1 %v34_v21 }
   0xc   :  { %1663 = vmatpush3.msra.mxu1 %v34_v21 }
   0xd   :  { %1664 = vmatprep.subr.mxu1 %v33_v22 }
   0xe   :  { %1640 = vmatmul.mubr.msk.f32.gmra.mxu0 %vm50_vm0, %v1907_v7  ;;  %1665 = vmatpush3.msra.mxu1 %v33_v22 }
   0xf   :  { %1642 = vmatprep.mubr.msk.f32.mxu0 %vm50_vm0, %v1912_v8  ;;  %1666 = vmatprep.subr.mxu1 %v32_v23 }
  0x10   :  { %1667 = vmatpush3.msra.mxu1 %v32_v23 }
  0x12   :  { %1643 = vmatmul.mubr.msk.f32.gmra.mxu0 %vm50_vm0, %v1921_v9 }
  0x13   :  { %1645 = vmatprep.mubr.msk.f32.mxu0 %vm50_vm0, %v1926_v10 }
  0x16   :  { %1646 = vmatmul.mubr.msk.f32.gmra.mxu0 %vm50_vm0, %v1935_v11 }
  0x17   :  { %1648 = vmatprep.mubr.msk.f32.mxu0 %vm50_vm0, %v1940_v12 }
  0x1a   :  { %1649 = vmatmul.mubr.msk.f32.gmra.mxu0 %vm50_vm0, %v1949_v13 }
  0x1b   :  { %1651 = vmatprep.mubr.msk.f32.mxu0 %vm50_vm0, %v1954_v14 }
  0x1e   :  { %1652 = vmatmul.mubr.msk.f32.gmra.mxu0 %vm50_vm0, %v1963_v15 }
  0x1f   :  { %1654 = vmatprep.mubr.msk.f32.mxu0 %vm50_vm0, %v1968_v16 }
  0x22   :  { %1655 = vmatmul.mubr.msk.f32.gmra.mxu0 %vm50_vm0, %v1977_v17 }
  0x23   :  { %1657 = vmatprep.mubr.msk.f32.mxu0 %vm50_vm0, %v1982_v18 }
  0x26   :  { %1658 = vmatmul.mubr.msk.f32.gmra.mxu0 %vm50_vm0, %v1991_v19 }
  0xca   :  { %v1638_v25 = vpop.f32.mrf.mxu0 }
  0xcb   :  { %v171_v26 = vadd.f32 %v1638_v25, %v1480_v24  ;;  %v2029_v25 = vld [vmem:[%s2689_s1 + $0x41] ss:$0 sm:$0xff] }
  0xcc   :  { %v165_v27 = vpop.f32.mrf.mxu0 }
  0xcd   :  { %v166_v28 = vadd.f32 %v1480_v24, %v165_v27 }
  0xce   :  { %v1641_v29 = vpop.f32.mrf.mxu0 }
  0xcf   :  { %1755 = vtanh.f32 %v166_v28  ;;  %v181_v30 = vadd.f32 %v1641_v29, %v1480_v24 }
  0xd0   :  { %1757 = vtanh.f32 %v171_v26  ;;  %v175_v31 = vpop.f32.mrf.mxu0 }
  0xd1   :  { %v176_v32 = vadd.f32 %v1480_v24, %v175_v31  ;;  %1759 = vtanh.f32 %v181_v30 }
  0xd2   :  { %v1644_v33 = vpop.f32.mrf.mxu0 }
  0xd3   :  { %1761 = vtanh.f32 %v176_v32  ;;  %v191_v34 = vadd.f32 %v1644_v33, %v1480_v24 }
  0xd4   :  { %v185_v35 = vpop.f32.mrf.mxu0 }
  0xd5   :  { %v186_v36 = vadd.f32 %v1480_v24, %v185_v35  ;;  %1763 = vtanh.f32 %v191_v34 }
  0xd6   :  { %v1647_v37 = vpop.f32.mrf.mxu0 }
  0xd7   :  { %1765 = vtanh.f32 %v186_v36  ;;  %v201_v38 = vadd.f32 %v1647_v37, %v1480_v24 }
  0xd8   :  { %v195_v39 = vpop.f32.mrf.mxu0 }
  0xd9   :  { %v196_v40 = vadd.f32 %v1480_v24, %v195_v39  ;;  %1767 = vtanh.f32 %v201_v38 }
  0xda   :  { %v1650_v41 = vpop.f32.mrf.mxu0 }
  0xdb   :  { %1769 = vtanh.f32 %v196_v40  ;;  %v211_v42 = vadd.f32 %v1650_v41, %v1480_v24 }
  0xdc   :  { %v1756_v43 = vpop.eup %1755  ;;  %v205_v44 = vpop.f32.mrf.mxu0 }
  0xdd   :  { %v1758_v45 = vpop.eup %1757  ;;  %v206_v46 = vadd.f32 %v1480_v24, %v205_v44  ;;  %1668 = vmatprep.mubr.msk.f32.mxu1 %vm50_vm0, %v1756_v43  ;;  %1771 = vtanh.f32 %v211_v42 }
  0xde   :  { %v1653_v47 = vpop.f32.mrf.mxu0  ;;  %1669 = vmatmul.mubr.msk.f32.vlgmr.msra.gmra.mxu1 %vm50_vm0, %v1758_v45  ;;  %v1760_v48 = vpop.eup %1759 }
  0xdf   :  { %1773 = vtanh.f32 %v206_v46  ;;  %v221_v49 = vadd.f32 %v1653_v47, %v1480_v24 }
  0xe0   :  { %v1762_v50 = vpop.eup %1761  ;;  %v215_v51 = vpop.f32.mrf.mxu0 }
  0xe1   :  { %v216_v52 = vadd.f32 %v1480_v24, %v215_v51  ;;  %1671 = vmatprep.mubr.msk.f32.mxu1 %vm50_vm0, %v1762_v50  ;;  %1775 = vtanh.f32 %v221_v49 }
  0xe2   :  { %v1656_v53 = vpop.f32.mrf.mxu0  ;;  %1672 = vmatmul.mubr.msk.f32.gmra.mxu1 %vm50_vm0, %v1760_v48  ;;  %v1764_v54 = vpop.eup %1763 }
  0xe3   :  { %1777 = vtanh.f32 %v216_v52  ;;  %v231_v55 = vadd.f32 %v1656_v53, %v1480_v24 }
  0xe4   :  { %v1766_v56 = vpop.eup %1765  ;;  %v225_v57 = vpop.f32.mrf.mxu0 }
  0xe5   :  { %v226_v58 = vadd.f32 %v1480_v24, %v225_v57  ;;  %1674 = vmatprep.mubr.msk.f32.mxu1 %vm50_vm0, %v1766_v56  ;;  %1779 = vtanh.f32 %v231_v55 }
  0xe6   :  { %v1659_v59 = vpop.f32.mrf.mxu0  ;;  %1675 = vmatmul.mubr.msk.f32.gmra.mxu1 %vm50_vm0, %v1764_v54  ;;  %v1768_v60 = vpop.eup %1767 }
  0xe7   :  { %1781 = vtanh.f32 %v226_v58  ;;  %v241_v61 = vadd.f32 %v1659_v59, %v1480_v24 }
  0xe8   :  { %v1770_v62 = vpop.eup %1769  ;;  %v235_v63 = vpop.f32.mrf.mxu0 }
  0xe9   :  { %v236_v0 = vadd.f32 %v1480_v24, %v235_v63  ;;  %1677 = vmatprep.mubr.msk.f32.mxu1 %vm50_vm0, %v1770_v62  ;;  %1783 = vtanh.f32 %v241_v61 }
  0xea   :  { %1678 = vmatmul.mubr.msk.f32.gmra.mxu1 %vm50_vm0, %v1768_v60  ;;  %v1772_v1 = vpop.eup %1771 }
  0xeb   :  { %1785 = vtanh.f32 %v236_v0 }
  0xec   :  { %v1774_v3 = vpop.eup %1773 }
  0xed   :  { %1680 = vmatprep.mubr.msk.f32.mxu1 %vm50_vm0, %v1774_v3 }
  0xee   :  { %1681 = vmatmul.mubr.msk.f32.gmra.mxu1 %vm50_vm0, %v1772_v1  ;;  %v1776_v4 = vpop.eup %1775 }
  0xf0   :  { %v1778_v20 = vpop.eup %1777 }
  0xf1   :  { %1683 = vmatprep.mubr.msk.f32.mxu1 %vm50_vm0, %v1778_v20 }
  0xf2   :  { %1684 = vmatmul.mubr.msk.f32.gmra.mxu1 %vm50_vm0, %v1776_v4  ;;  %v1780_v21 = vpop.eup %1779 }
  0xf4   :  { %v1782_v22 = vpop.eup %1781 }
  0xf5   :  { %1686 = vmatprep.mubr.msk.f32.mxu1 %vm50_vm0, %v1782_v22 }
  0xf6   :  { %1687 = vmatmul.mubr.msk.f32.gmra.mxu1 %vm50_vm0, %v1780_v21  ;;  %v1784_v23 = vpop.eup %1783 }
  0xf8   :  { %v1786_v24 = vpop.eup %1785 }
  0xf9   :  { %1689 = vmatprep.mubr.msk.f32.mxu1 %vm50_vm0, %v1786_v24 }
  0xfa   :  { %1690 = vmatmul.mubr.msk.f32.gmra.mxu1 %vm50_vm0, %v1784_v23 }
 0x19e   :  { %v1670_v26 = vpop.f32.mrf.mxu1 }
 0x19f   :  { %v2032_v27 = vadd.f32 %v1670_v26, %v2029_v25 }
 0x1a0   :  { %v378_v28 = vpop.f32.mrf.mxu1 }
 0x1a1   :  { %v2035_v29 = vadd.f32 %v2029_v25, %v378_v28  ;;  %v458_v30 = vmul.f32 0.5, %v2032_v27 }
 0x1a2   :  { %v1673_v31 = vpop.f32.mrf.mxu1 }
 0x1a3   :  { %v457_v32 = vmul.f32 0.5, %v2035_v29  ;;  %v2040_v33 = vadd.f32 %v1673_v31, %v2029_v25  ;;  %v475_v38 = vmul.f32 1.442695, %v458_v30 }
 0x1a4   :  { %v388_v34 = vpop.f32.mrf.mxu1 }
 0x1a5   :  { %v473_v35 = vmul.f32 1.442695, %v457_v32  ;;  %v460_v36 = vmul.f32 0.5, %v2040_v33  ;;  %v2044_v37 = vadd.f32 %v2029_v25, %v388_v34 }
 0x1a6   :  { %v1676_v39 = vpop.f32.mrf.mxu1 }
 0x1a7   :  { %1787 = vpow2.f32 %v473_v35  ;;  %v459_v40 = vmul.f32 0.5, %v2044_v37  ;;  %v2048_v41 = vadd.f32 %v1676_v39, %v2029_v25  ;;  %v479_v42 = vmul.f32 1.442695, %v460_v36 }
 0x1a8   :  { %v398_v43 = vpop.f32.mrf.mxu1  ;;  %1789 = vpow2.f32 %v475_v38 }
 0x1a9   :  { %v477_v44 = vmul.f32 1.442695, %v459_v40  ;;  %v462_v45 = vmul.f32 0.5, %v2048_v41  ;;  %v2052_v46 = vadd.f32 %v2029_v25, %v398_v43 }
 0x1aa   :  { %v1679_v47 = vpop.f32.mrf.mxu1 }
 0x1ab   :  { %1791 = vpow2.f32 %v477_v44  ;;  %v461_v48 = vmul.f32 0.5, %v2052_v46  ;;  %v2056_v49 = vadd.f32 %v1679_v47, %v2029_v25  ;;  %v483_v51 = vmul.f32 1.442695, %v462_v45 }
 0x1ac   :  { %1793 = vpow2.f32 %v479_v42  ;;  %v408_v50 = vpop.f32.mrf.mxu1 }
 0x1ad   :  { %v481_v52 = vmul.f32 1.442695, %v461_v48  ;;  %v464_v53 = vmul.f32 0.5, %v2056_v49  ;;  %v2060_v54 = vadd.f32 %v2029_v25, %v408_v50 }
 0x1ae   :  { %v1682_v55 = vpop.f32.mrf.mxu1 }
 0x1af   :  { %1795 = vpow2.f32 %v481_v52  ;;  %v463_v56 = vmul.f32 0.5, %v2060_v54  ;;  %v2064_v57 = vadd.f32 %v1682_v55, %v2029_v25  ;;  %v487_v58 = vmul.f32 1.442695, %v464_v53 }
 0x1b0   :  { %v418_v59 = vpop.f32.mrf.mxu1  ;;  %1797 = vpow2.f32 %v483_v51 }
 0x1b1   :  { %v485_v60 = vmul.f32 1.442695, %v463_v56  ;;  %v466_v61 = vmul.f32 0.5, %v2064_v57  ;;  %v2068_v62 = vadd.f32 %v2029_v25, %v418_v59 }
 0x1b2   :  { %v1685_v63 = vpop.f32.mrf.mxu1 }
 0x1b3   :  { %1799 = vpow2.f32 %v485_v60  ;;  %v465_v0 = vmul.f32 0.5, %v2068_v62  ;;  %v2072_v1 = vadd.f32 %v1685_v63, %v2029_v25  ;;  %v491_v20 = vmul.f32 1.442695, %v466_v61 }
 0x1b4   :  { %v1788_v3 = vpop.eup %1787  ;;  %1801 = vpow2.f32 %v487_v58  ;;  %v428_v4 = vpop.f32.mrf.mxu1 }
 0x1b5   :  { %v489_v21 = vmul.f32 1.442695, %v465_v0  ;;  %v468_v22 = vmul.f32 0.5, %v2072_v1  ;;  %v2076_v23 = vadd.f32 %v2029_v25, %v428_v4  ;;  %521 = vrot.lane.b32.xlu0 %v1788_v3, %s1851_s4  ;;  %v1790_v26 = vpop.eup %1789  ;;  %v37_v0 = vld [vmem:[%s2689_s1 + $0x42] sm:$0x3] }
 0x1b6   :  { %v1688_v24 = vpop.f32.mrf.mxu1  ;;  %1692 = vmatprep.subr.msk.mxu0 %vm718_vm1, %v37_v0 }
 0x1b7   :  { %1803 = vpow2.f32 %v489_v21  ;;  %v467_v28 = vmul.f32 0.5, %v2076_v23  ;;  %v2081_v30 = vadd.f32 %v1688_v24, %v2029_v25  ;;  %v495_v32 = vmul.f32 1.442695, %v468_v22  ;;  %1693 = vmatpush3.msk.msra.mxu0 %vm718_vm1, %v37_v0 }
 0x1b8   :  { %v1792_v31 = vpop.eup %1791  ;;  %v438_v34 = vpop.f32.mrf.mxu1  ;;  %1805 = vpow2.f32 %v491_v20 }
 0x1b9   :  { %v1794_v35 = vpop.eup %1793  ;;  %v493_v36 = vmul.f32 1.442695, %v467_v28  ;;  %v470_v38 = vmul.f32 0.5, %v2081_v30  ;;  %v2085_v39 = vadd.f32 %v2029_v25, %v438_v34  ;;  %525 = vrot.lane.b32.xlu1 %v1792_v31, %s1851_s4  ;;  %523 = vrot.lane.b32.xlu0 %v1790_v26, %s1851_s4 }
 0x1ba   :  { %v1691_v40 = vpop.f32.mrf.mxu1 }
 0x1bb   :  { %1807 = vpow2.f32 %v493_v36  ;;  %v469_v42 = vmul.f32 0.5, %v2085_v39  ;;  %v2091_v43 = vadd.f32 %v1691_v40, %v2029_v25  ;;  %v499_v47 = vmul.f32 1.442695, %v470_v38 }
 0x1bc   :  { %v1796_v44 = vpop.eup %1795  ;;  %1809 = vpow2.f32 %v495_v32  ;;  %v448_v45 = vpop.f32.mrf.mxu1 }
 0x1bd   :  { %v497_v48 = vmul.f32 1.442695, %v469_v42  ;;  %v472_v50 = vmul.f32 0.5, %v2091_v43  ;;  %v2095_v51 = vadd.f32 %v2029_v25, %v448_v45  ;;  %527 = vrot.lane.b32.xlu1 %v1794_v35, %s1851_s4  ;;  %529 = vrot.lane.b32.xlu0 %v1796_v44, %s1851_s4  ;;  %v1798_v52 = vpop.eup %1797 }
 0x1bf   :  { %2693 = vst [vmem:[#allocation2_spill] sm:$0xff] %v2095_v51  ;;  %1811 = vpow2.f32 %v497_v48  ;;  %v471_v53 = vmul.f32 0.5, %v2095_v51  ;;  %v503_v58 = vmul.f32 1.442695, %v472_v50 }
 0x1c0   :  { %v1800_v55 = vpop.eup %1799  ;;  %1813 = vpow2.f32 %v499_v47 }
 0x1c1   :  { %v1802_v56 = vpop.eup %1801  ;;  %v501_v59 = vmul.f32 1.442695, %v471_v53  ;;  %531 = vrot.lane.b32.xlu1 %v1798_v52, %s1851_s4  ;;  %533 = vrot.lane.b32.xlu0 %v1800_v55, %s1851_s4 }
 0x1c3   :  { %1815 = vpow2.f32 %v501_v59 }
 0x1c4   :  { %v1804_v25 = vpop.eup %1803  ;;  %1817 = vpow2.f32 %v503_v58 }
 0x1c5   :  { %535 = vrot.lane.b32.xlu1 %v1802_v56, %s1851_s4  ;;  %537 = vrot.lane.b32.xlu0 %v1804_v25, %s1851_s4  ;;  %v1806_v60 = vpop.eup %1805 }
 0x1c8   :  { %v1808_v61 = vpop.eup %1807 }
 0x1c9   :  { %v1810_v63 = vpop.eup %1809  ;;  %539 = vrot.lane.b32.xlu1 %v1806_v60, %s1851_s4  ;;  %541 = vrot.lane.b32.xlu0 %v1808_v61, %s1851_s4 }
 0x1cc   :  { %v1812_v3 = vpop.eup %1811 }
 0x1cd   :  { %543 = vrot.lane.b32.xlu1 %v1810_v63, %s1851_s4  ;;  %545 = vrot.lane.b32.xlu0 %v1812_v3, %s1851_s4  ;;  %v1814_v4 = vpop.eup %1813 }
 0x1d0   :  { %v1816_v20 = vpop.eup %1815 }
 0x1d1   :  { %547 = vrot.lane.b32.xlu1 %v1814_v4, %s1851_s4  ;;  %549 = vrot.lane.b32.xlu0 %v1816_v20, %s1851_s4  ;;  %v1818_v21 = vpop.eup %1817 }
 0x1d5   :  { %551 = vrot.lane.b32.xlu1 %v1818_v21, %s1851_s4 }
 0x227   :  { %v522_v22 = vpop.permute.xlu0 %521 }
 0x228   :  { %v569_v24 = vmul.f32 %v522_v22, %v1880_v2 }
 0x22a   :  { %601 = vrot.lane.b32.xlu0 %v569_v24, %s1852_s7 }
 0x22b   :  { %v526_v26 = vpop.permute.xlu1 %525  ;;  %v524_v28 = vpop.permute.xlu0 %523 }
 0x22c   :  { %v571_v31 = vmul.f32 %v526_v26, %v1898_v6  ;;  %v570_v32 = vmul.f32 %v524_v28, %v1893_v5 }
 0x22e   :  { %605 = vrot.lane.b32.xlu0 %v571_v31, %s1852_s7  ;;  %603 = vrot.lane.b32.xlu1 %v570_v32, %s1852_s7 }
 0x22f   :  { %v528_v34 = vpop.permute.xlu1 %527  ;;  %v530_v35 = vpop.permute.xlu0 %529 }
 0x230   :  { %v572_v36 = vmul.f32 %v528_v34, %v1907_v7  ;;  %v573_v38 = vmul.f32 %v530_v35, %v1912_v8 }
 0x232   :  { %607 = vrot.lane.b32.xlu1 %v572_v36, %s1852_s7  ;;  %609 = vrot.lane.b32.xlu0 %v573_v38, %s1852_s7 }
 0x233   :  { %v532_v2 = vpop.permute.xlu1 %531  ;;  %v534_v40 = vpop.permute.xlu0 %533 }
 0x234   :  { %v574_v6 = vmul.f32 %v532_v2, %v1921_v9  ;;  %v575_v5 = vmul.f32 %v534_v40, %v1926_v10 }
 0x236   :  { %611 = vrot.lane.b32.xlu1 %v574_v6, %s1852_s7  ;;  %613 = vrot.lane.b32.xlu0 %v575_v5, %s1852_s7 }
 0x237   :  { %v536_v42 = vpop.permute.xlu1 %535  ;;  %v538_v44 = vpop.permute.xlu0 %537 }
 0x238   :  { %v576_v7 = vmul.f32 %v536_v42, %v1935_v11  ;;  %v577_v8 = vmul.f32 %v538_v44, %v1940_v12 }
 0x23a   :  { %615 = vrot.lane.b32.xlu1 %v576_v7, %s1852_s7  ;;  %617 = vrot.lane.b32.xlu0 %v577_v8, %s1852_s7  ;;  %v44_v7 = vld [vmem:[%s2689_s1 + $0x5f] sm:$0xff]  ;;  %v43_v8 = vld [vmem:[%s2689_s1 + $0x57] sm:$0xff] }
 0x23b   :  { %v540_v45 = vpop.permute.xlu1 %539  ;;  %v542_v47 = vpop.permute.xlu0 %541  ;;  %1718 = vmatprep.subr.mxu1 %v44_v7 }
 0x23c   :  { %v578_v9 = vmul.f32 %v540_v45, %v1949_v13  ;;  %v579_v10 = vmul.f32 %v542_v47, %v1954_v14  ;;  %1719 = vmatpush3.msra.mxu1 %v44_v7  ;;  %v2235_v45 = vld [vmem:[%s2689_s1 + $0x44] ss:$0 sm:$0xff] }
 0x23d   :  { %1720 = vmatprep.subr.mxu1 %v43_v8 }
 0x23e   :  { %619 = vrot.lane.b32.xlu1 %v578_v9, %s1852_s7  ;;  %621 = vrot.lane.b32.xlu0 %v579_v10, %s1852_s7  ;;  %v42_v10 = vld [vmem:[%s2689_s1 + $0x4f] sm:$0xff] }
 0x23f   :  { %v544_v48 = vpop.permute.xlu1 %543  ;;  %v546_v50 = vpop.permute.xlu0 %545  ;;  %1721 = vmatpush3.msra.mxu1 %v43_v8 }
 0x240   :  { %v580_v11 = vmul.f32 %v544_v48, %v1963_v15  ;;  %v581_v12 = vmul.f32 %v546_v50, %v1968_v16  ;;  %1722 = vmatprep.subr.mxu1 %v42_v10 }
 0x241   :  { %1723 = vmatpush3.msra.mxu1 %v42_v10 }
 0x242   :  { %623 = vrot.lane.b32.xlu1 %v580_v11, %s1852_s7  ;;  %625 = vrot.lane.b32.xlu0 %v581_v12, %s1852_s7  ;;  %v41_v11 = vld [vmem:[%s2689_s1 + $0x47] sm:$0xff] }
 0x243   :  { %v548_v52 = vpop.permute.xlu1 %547  ;;  %v550_v53 = vpop.permute.xlu0 %549  ;;  %1724 = vmatprep.subr.mxu1 %v41_v11 }
 0x244   :  { %v582_v13 = vmul.f32 %v548_v52, %v1977_v17  ;;  %v583_v14 = vmul.f32 %v550_v53, %v1982_v18  ;;  %1725 = vmatpush3.msra.mxu1 %v41_v11 }
 0x246   :  { %627 = vrot.lane.b32.xlu1 %v582_v13, %s1852_s7  ;;  %629 = vrot.lane.b32.xlu0 %v583_v14, %s1852_s7 }
 0x247   :  { %v552_v55 = vpop.permute.xlu1 %551 }
 0x248   :  { %v584_v56 = vmul.f32 %v552_v55, %v1991_v19 }
 0x24a   :  { %631 = vrot.lane.b32.xlu1 %v584_v56, %s1852_s7 }
 0x29c   :  { %v602_v15 = vpop.permute.xlu0 %601 }
 0x29d   :  { %v2147_v16 = vadd.f32 %v602_v15, %v2035_v29 }
 0x29f   :  { %1694 = vmatprep.mubr.msk.f32.mxu0 %vm669_vm2, %v2147_v16 }
 0x2a0   :  { %v604_v17 = vpop.permute.xlu1 %603  ;;  %v606_v58 = vpop.permute.xlu0 %605 }
 0x2a1   :  { %v2152_v18 = vadd.f32 %v604_v17, %v2032_v27  ;;  %v2155_v59 = vadd.f32 %v606_v58, %v2044_v37 }
 0x2a3   :  { %1695 = vmatmul.mubr.msk.f32.vlgmr.msra.gmra.mxu0 %vm669_vm2, %v2152_v18 }
 0x2a4   :  { %v608_v19 = vpop.permute.xlu1 %607  ;;  %1697 = vmatprep.mubr.msk.f32.mxu0 %vm669_vm2, %v2155_v59  ;;  %v610_v25 = vpop.permute.xlu0 %609 }
 0x2a5   :  { %v2162_v60 = vadd.f32 %v608_v19, %v2040_v33  ;;  %v2165_v61 = vadd.f32 %v610_v25, %v2052_v46 }
 0x2a7   :  { %1698 = vmatmul.mubr.msk.f32.gmra.mxu0 %vm669_vm2, %v2162_v60 }
 0x2a8   :  { %v612_v63 = vpop.permute.xlu1 %611  ;;  %1700 = vmatprep.mubr.msk.f32.mxu0 %vm669_vm2, %v2165_v61  ;;  %v614_v0 = vpop.permute.xlu0 %613 }
 0x2a9   :  { %v2172_v3 = vadd.f32 %v612_v63, %v2048_v41  ;;  %v2175_v4 = vadd.f32 %v614_v0, %v2060_v54 }
 0x2ab   :  { %1701 = vmatmul.mubr.msk.f32.gmra.mxu0 %vm669_vm2, %v2172_v3 }
 0x2ac   :  { %v616_v20 = vpop.permute.xlu1 %615  ;;  %1703 = vmatprep.mubr.msk.f32.mxu0 %vm669_vm2, %v2175_v4  ;;  %v618_v21 = vpop.permute.xlu0 %617 }
 0x2ad   :  { %v2182_v22 = vadd.f32 %v616_v20, %v2056_v49  ;;  %v2185_v24 = vadd.f32 %v618_v21, %v2068_v62 }
 0x2af   :  { %1704 = vmatmul.mubr.msk.f32.gmra.mxu0 %vm669_vm2, %v2182_v22 }
 0x2b0   :  { %v620_v26 = vpop.permute.xlu1 %619  ;;  %1706 = vmatprep.mubr.msk.f32.mxu0 %vm669_vm2, %v2185_v24  ;;  %v622_v28 = vpop.permute.xlu0 %621 }
 0x2b1   :  { %v2192_v31 = vadd.f32 %v620_v26, %v2064_v57  ;;  %v2195_v32 = vadd.f32 %v622_v28, %v2076_v23 }
 0x2b3   :  { %1707 = vmatmul.mubr.msk.f32.gmra.mxu0 %vm669_vm2, %v2192_v31 }
 0x2b4   :  { %v624_v34 = vpop.permute.xlu1 %623  ;;  %1709 = vmatprep.mubr.msk.f32.mxu0 %vm669_vm2, %v2195_v32  ;;  %v626_v35 = vpop.permute.xlu0 %625 }
 0x2b5   :  { %v2202_v36 = vadd.f32 %v624_v34, %v2072_v1  ;;  %v2205_v38 = vadd.f32 %v626_v35, %v2085_v39 }
 0x2b7   :  { %1710 = vmatmul.mubr.msk.f32.gmra.mxu0 %vm669_vm2, %v2202_v36 }
 0x2b8   :  { %v628_v2 = vpop.permute.xlu1 %627  ;;  %1712 = vmatprep.mubr.msk.f32.mxu0 %vm669_vm2, %v2205_v38  ;;  %v630_v40 = vpop.permute.xlu0 %629 }
 0x2b9   :  { %v2212_v6 = vadd.f32 %v628_v2, %v2081_v30  ;;  %v2215_v5 = vadd.f32 %v630_v40, %v2095_v51  ;;  %v2257_v40 = vld [vmem:[%s2689_s1 + $0x45] ss:$0 sm:$0xff] }
 0x2bb   :  { %1713 = vmatmul.mubr.msk.f32.gmra.mxu0 %vm669_vm2, %v2212_v6 }
 0x2bc   :  { %v632_v42 = vpop.permute.xlu1 %631  ;;  %1715 = vmatprep.mubr.msk.f32.mxu0 %vm669_vm2, %v2215_v5 }
 0x2bd   :  { %v2222_v44 = vadd.f32 %v632_v42, %v2091_v43 }
 0x2bf   :  { %1716 = vmatmul.mubr.msk.f32.gmra.mxu0 %vm669_vm2, %v2222_v44 }
 0x363   :  { %v1696_v47 = vpop.f32.mrf.mxu0 }
 0x364   :  { %v794_v9 = vadd.f32 %v1696_v47, %v2235_v45 }
 0x365   :  { %v788_v48 = vpop.f32.mrf.mxu0 }
 0x366   :  { %1819 = vtanh.f32 %v794_v9  ;;  %v789_v50 = vadd.f32 %v2235_v45, %v788_v48 }
 0x367   :  { %v1699_v12 = vpop.f32.mrf.mxu0 }
 0x368   :  { %1821 = vtanh.f32 %v789_v50 }
 0x369   :  { %v798_v52 = vpop.f32.mrf.mxu0 }
 0x36b   :  { %v1702_v53 = vpop.f32.mrf.mxu0 }
 0x36c   :  { %v814_v13 = vadd.f32 %v1702_v53, %v2235_v45 }
 0x36d   :  { %v808_v14 = vpop.f32.mrf.mxu0 }
 0x36e   :  { %1823 = vtanh.f32 %v814_v13  ;;  %v809_v55 = vadd.f32 %v2235_v45, %v808_v14 }
 0x36f   :  { %v1705_v56 = vpop.f32.mrf.mxu0 }
 0x370   :  { %1825 = vtanh.f32 %v809_v55  ;;  %v824_v15 = vadd.f32 %v1705_v56, %v2235_v45 }
 0x371   :  { %v818_v17 = vpop.f32.mrf.mxu0 }
 0x372   :  { %1827 = vtanh.f32 %v824_v15  ;;  %v819_v58 = vadd.f32 %v2235_v45, %v818_v17 }
 0x373   :  { %v1820_v19 = vpop.eup %1819  ;;  %v1708_v25 = vpop.f32.mrf.mxu0 }
 0x374   :  { %1829 = vtanh.f32 %v819_v58  ;;  %993 = vrot.lane.b32.xlu1 %v1820_v19, %s1852_s7 }
 0x375   :  { %v1822_v63 = vpop.eup %1821  ;;  %v828_v0 = vpop.f32.mrf.mxu0 }
 0x376   :  { %v829_v20 = vadd.f32 %v2235_v45, %v828_v0  ;;  %991 = vrot.lane.b32.xlu0 %v1822_v63, %s1852_s7 }
 0x377   :  { %v1711_v21 = vpop.f32.mrf.mxu0 }
 0x378   :  { %1831 = vtanh.f32 %v829_v20  ;;  %v844_v26 = vadd.f32 %v1711_v21, %v2235_v45 }
 0x379   :  { %v838_v28 = vpop.f32.mrf.mxu0 }
 0x37a   :  { %1833 = vtanh.f32 %v844_v26  ;;  %v839_v34 = vadd.f32 %v2235_v45, %v838_v28  ;;  %v887_v26 = vmul.f32 %v1822_v63, %v2257_v40  ;;  %v888_v28 = vmul.f32 %v1820_v19, %v2257_v40 }
 0x37b   :  { %v1824_v35 = vpop.eup %1823  ;;  %v1714_v2 = vpop.f32.mrf.mxu0 }
 0x37c   :  { %1835 = vtanh.f32 %v839_v34  ;;  %v854_v42 = vadd.f32 %v1714_v2, %v2235_v45  ;;  %v892_v7 = vmul.f32 %v1824_v35, %v2257_v40  ;;  %v903_v34 = vsel %vm50_vm0, %v887_v26, 0.0 }
 0x37d   :  { %v1826_v8 = vpop.eup %1825  ;;  %v848_v47 = vpop.f32.mrf.mxu0  ;;  %v804_v2 = vadd.f32 %v1699_v12, %v2235_v45  ;;  %v834_v26 = vadd.f32 %v1708_v25, %v2235_v45 }
 0x37e   :  { %1837 = vtanh.f32 %v854_v42  ;;  %v849_v9 = vadd.f32 %v2235_v45, %v848_v47  ;;  %v891_v10 = vmul.f32 %v1826_v8, %v2257_v40  ;;  %v906_v42 = vsel %vm50_vm0, %v888_v28, 0.0 }
 0x37f   :  { %v1828_v48 = vpop.eup %1827  ;;  %v799_v47 = vadd.f32 %v2235_v45, %v798_v52 }
 0x380   :  { %1839 = vtanh.f32 %v849_v9  ;;  %v2264_v50 = vmul.f32 %v1828_v48, %v2257_v40  ;;  %v915_v28 = vsel %vm50_vm0, %v891_v10, 0.0  ;;  %v1717_v10 = vpop.f32.mrf.mxu0 }
 0x381   :  { %v1830_v11 = vpop.eup %1829  ;;  %1841 = vtanh.f32 %v804_v2  ;;  %v864_v2 = vadd.f32 %v1717_v10, %v2235_v45 }
 0x382   :  { %v893_v53 = vmul.f32 %v1830_v11, %v2257_v40  ;;  %1843 = vtanh.f32 %v799_v47 }
 0x383   :  { %1845 = vtanh.f32 %v834_v26 }
 0x384   :  { %v921_v25 = vsel %vm50_vm0, %v893_v53, 0.0  ;;  %1847 = vtanh.f32 %v864_v2 }
 0x385   :  { %v1832_v13 = vpop.eup %1831 }
 0x386   :  { %v2268_v14 = vmul.f32 %v1832_v13, %v2257_v40 }
 0x387   :  { %v1834_v55 = vpop.eup %1833 }
 0x388   :  { %v2271_v56 = vmul.f32 %v1834_v55, %v2257_v40 }
 0x389   :  { %v1836_v15 = vpop.eup %1835 }
 0x38a   :  { %v2274_v17 = vmul.f32 %v1836_v15, %v2257_v40 }
 0x38b   :  { %v1838_v58 = vpop.eup %1837 }
 0x38c   :  { %v2277_v0 = vmul.f32 %v1838_v58, %v2257_v40 }
 0x38d   :  { %v1840_v20 = vpop.eup %1839 }
 0x38e   :  { %v2280_v21 = vmul.f32 %v1840_v20, %v2257_v40  ;;  %v1842_v9 = vpop.eup %1841 }
 0x38f   :  { %v1844_v51 = vpop.eup %1843  ;;  %v890_v19 = vmul.f32 %v1842_v9, %v2257_v40 }
 0x390   :  { %v889_v63 = vmul.f32 %v1844_v51, %v2257_v40 }
 0x391   :  { %v912_v12 = vsel %vm50_vm0, %v890_v19, 0.0  ;;  %v939_v19 = vsel %vm50_vm0, %v2280_v21, 0.0 }
 0x392   :  { %v909_v52 = vsel %vm50_vm0, %v889_v63, 0.0 }
 0x395   :  { %904 = vadd.xlane.f32.xlu0 %v903_v34 }
 0x398   :  { %907 = vadd.xlane.f32.xlu1 %v906_v42  ;;  %v858_v42 = vpop.f32.mrf.mxu0 }
 0x3a9   :  { %997 = vrot.lane.b32.xlu1 %v1842_v9, %s1852_s7 }
 0x3ab   :  { %995 = vrot.lane.b32.xlu0 %v1844_v51, %s1852_s7  ;;  %v918_v51 = vsel %vm50_vm0, %v892_v7, 0.0 }
 0x3ad   :  { %1001 = vrot.lane.b32.xlu1 %v1824_v35, %s1852_s7  ;;  %v1846_v35 = vpop.eup %1845 }
 0x3ae   :  { %v2315_v53 = vpop.eup %1847 }
 0x3b1   :  { %1005 = vrot.lane.b32.xlu1 %v1828_v48, %s1852_s7 }
 0x3ca   :  { %913 = vadd.xlane.f32.xlu0 %v912_v12 }
 0x3ce   :  { %910 = vadd.xlane.f32.xlu0 %v909_v52 }
 0x3d5   :  { %916 = vadd.xlane.f32.xlu1 %v915_v28 }
 0x3e4   :  { %999 = vrot.lane.b32.xlu0 %v1826_v8, %s1852_s7  ;;  %v859_v8 = vadd.f32 %v2235_v45, %v858_v42 }
 0x3e6   :  { %1009 = vrot.lane.b32.xlu1 %v1846_v35, %s1852_s7  ;;  %v994_v34 = vpop.permute.xlu1 %993  ;;  %1849 = vtanh.f32 %v859_v8 }
 0x3e8   :  { %v992_v48 = vpop.permute.xlu0 %991 }
 0x3e9   :  { %1726 = vmatprep.mubr.msk.f32.mxu1 %vm50_vm0, %v992_v48 }
 0x3ea   :  { %1727 = vmatmul.mubr.msk.f32.vlgmr.msra.gmra.mxu1 %vm50_vm0, %v994_v34 }
 0x403   :  { %919 = vadd.xlane.f32.xlu0 %v918_v51 }
 0x40a   :  { %922 = vadd.xlane.f32.xlu1 %v921_v25 }
 0x419   :  { %1003 = vrot.lane.b32.xlu0 %v1830_v11, %s1852_s7  ;;  %v2322_v11 = vpop.eup %1849 }
 0x41b   :  { %1013 = vrot.lane.b32.xlu1 %v1834_v55, %s1852_s7  ;;  %v924_v55 = vsel %vm50_vm0, %v2264_v50, 0.0  ;;  %v942_v50 = vsel %vm50_vm0, %v2277_v0, 0.0 }
 0x41d   :  { %1007 = vrot.lane.b32.xlu0 %v1832_v13, %s1852_s7  ;;  %v927_v13 = vsel %vm50_vm0, %v2268_v14, 0.0  ;;  %v936_v14 = vsel %vm50_vm0, %v2271_v56, 0.0 }
 0x41e   :  { %v2309_v47 = vpop.xlane.xlu0 %904 }
 0x41f   :  { %1017 = vrot.lane.b32.xlu1 %v1838_v58, %s1852_s7  ;;  %v933_v58 = vsel %vm50_vm0, %v2274_v17, 0.0 }
 0x421   :  { %v2312_v7 = vpop.xlane.xlu1 %907  ;;  %1011 = vrot.lane.b32.xlu0 %v1836_v15, %s1852_s7  ;;  %v896_v15 = vmul.f32 %v1846_v35, %v2257_v40 }
 0x422   :  { %v996_v9 = vpop.permute.xlu0 %995 }
 0x423   :  { %1021 = vrot.lane.b32.xlu1 %v2315_v53, %s1852_s7  ;;  %1729 = vmatprep.mubr.msk.f32.mxu1 %vm50_vm0, %v996_v9 }
 0x425   :  { %v998_v45 = vpop.permute.xlu1 %997  ;;  %1015 = vrot.lane.b32.xlu0 %v1840_v20, %s1852_s7  ;;  %v930_v20 = vsel %vm50_vm0, %v896_v15, 0.0 }
 0x426   :  { %1730 = vmatmul.mubr.msk.f32.gmra.mxu1 %vm50_vm0, %v998_v45 }
 0x429   :  { %1019 = vrot.lane.b32.xlu0 %v2322_v11, %s1852_s7  ;;  %v1002_v52 = vpop.permute.xlu1 %1001 }
 0x447   :  { %928 = vadd.xlane.f32.xlu1 %v927_v13 }
 0x448   :  { %925 = vadd.xlane.f32.xlu0 %v924_v55 }
 0x44b   :  { %934 = vadd.xlane.f32.xlu1 %v933_v58 }
 0x44c   :  { %931 = vadd.xlane.f32.xlu0 %v930_v20 }
 0x44f   :  { %940 = vadd.xlane.f32.xlu1 %v939_v19 }
 0x450   :  { %937 = vadd.xlane.f32.xlu0 %v936_v14 }
 0x453   :  { %v2338_v12 = vpop.xlane.xlu0 %913 }
 0x454   :  { %943 = vadd.xlane.f32.xlu0 %v942_v50 }
 0x457   :  { %v2342_v63 = vpop.xlane.xlu0 %910 }
 0x45b   :  { %v1000_v17 = vpop.permute.xlu0 %999 }
 0x45c   :  { %1732 = vmatprep.mubr.msk.f32.mxu1 %vm50_vm0, %v1000_v17 }
 0x45d   :  { %1733 = vmatmul.mubr.msk.f32.gmra.mxu1 %vm50_vm0, %v1002_v52 }
 0x460   :  { %1266 = vrot.lane.b32.xlu1 %v2152_v18, %s1853_s20 }
 0x464   :  { %1270 = vrot.lane.b32.xlu1 %v2162_v60, %s1853_s20 }
 0x468   :  { %1274 = vrot.lane.b32.xlu1 %v2172_v3, %s1853_s20 }
 0x46a   :  { %1264 = vrot.lane.b32.xlu0 %v2147_v16, %s1853_s20  ;;  %v1006_v16 = vpop.permute.xlu1 %1005 }
 0x46c   :  { %1278 = vrot.lane.b32.xlu1 %v2182_v22, %s1853_s20 }
 0x46e   :  { %1268 = vrot.lane.b32.xlu0 %v2155_v59, %s1853_s20  ;;  %v917_v18 = vpop.xlane.xlu1 %916 }
 0x470   :  { %1282 = vrot.lane.b32.xlu1 %v2192_v31, %s1853_s20 }
 0x472   :  { %1272 = vrot.lane.b32.xlu0 %v2165_v61, %s1853_s20 }
 0x474   :  { %1286 = vrot.lane.b32.xlu1 %v2202_v36, %s1853_s20 }
 0x476   :  { %1276 = vrot.lane.b32.xlu0 %v2175_v4, %s1853_s20  ;;  %v901_v4 = vmul.f32 %v2322_v11, %v2257_v40 }
 0x478   :  { %1290 = vrot.lane.b32.xlu1 %v2212_v6, %s1853_s20  ;;  %v945_v22 = vsel %vm50_vm0, %v901_v4, 0.0 }
 0x47a   :  { %1280 = vrot.lane.b32.xlu0 %v2185_v24, %s1853_s20  ;;  %v2401_v24 = vld [vmem:[%s2689_s1 + $0x46] ss:$0 sm:$0xff] }
 0x47b   :  { %v955_v31 = vadd.f32 %v2401_v24, %v2309_v47 }
 0x47c   :  { %1294 = vrot.lane.b32.xlu1 %v2222_v44, %s1853_s20 }
 0x47e   :  { %1284 = vrot.lane.b32.xlu0 %v2195_v32, %s1853_s20 }
 0x480   :  { %1330 = vrot.lane.b32.xlu1 %v2032_v27, %s1854_s21  ;;  %v1010_v27 = vpop.permute.xlu1 %1009 }
 0x482   :  { %1288 = vrot.lane.b32.xlu0 %v2205_v38, %s1853_s20 }
 0x484   :  { %1334 = vrot.lane.b32.xlu1 %v2040_v33, %s1854_s21 }
 0x486   :  { %1292 = vrot.lane.b32.xlu0 %v2215_v5, %s1853_s20 }
 0x488   :  { %1338 = vrot.lane.b32.xlu1 %v2048_v41, %s1854_s21 }
 0x48a   :  { %1328 = vrot.lane.b32.xlu0 %v2035_v29, %s1854_s21 }
 0x48c   :  { %1342 = vrot.lane.b32.xlu1 %v2056_v49, %s1854_s21  ;;  %v920_v59 = vpop.xlane.xlu0 %919 }
 0x48d   :  { %v960_v36 = vadd.f32 %v2401_v24, %v920_v59 }
 0x48e   :  { %1332 = vrot.lane.b32.xlu0 %v2044_v37, %s1854_s21 }
 0x490   :  { %1346 = vrot.lane.b32.xlu1 %v2064_v57, %s1854_s21  ;;  %v1004_v33 = vpop.permute.xlu0 %1003 }
 0x491   :  { %1735 = vmatprep.mubr.msk.f32.mxu1 %vm50_vm0, %v1004_v33 }
 0x492   :  { %1336 = vrot.lane.b32.xlu0 %v2052_v46, %s1854_s21  ;;  %1736 = vmatmul.mubr.msk.f32.gmra.mxu1 %vm50_vm0, %v1006_v16 }
 0x493   :  { %v923_v29 = vpop.xlane.xlu1 %922 }
 0x494   :  { %1350 = vrot.lane.b32.xlu1 %v2072_v1, %s1854_s21  ;;  %v1008_v41 = vpop.permute.xlu0 %1007  ;;  %v902_v1 = vmul.f32 %v2315_v53, %v2257_v40 }
 0x495   :  { %1738 = vmatprep.mubr.msk.f32.mxu1 %vm50_vm0, %v1008_v41 }
 0x496   :  { %1739 = vmatmul.mubr.msk.f32.gmra.mxu1 %vm50_vm0, %v1010_v27  ;;  %v948_v3 = vsel %vm50_vm0, %v902_v1, 0.0 }
 0x497   :  { %v1014_v37 = vpop.permute.xlu1 %1013 }
 0x498   :  { %v1012_v49 = vpop.permute.xlu0 %1011 }
 0x499   :  { %1741 = vmatprep.mubr.msk.f32.mxu1 %vm50_vm0, %v1012_v49 }
 0x49a   :  { %1742 = vmatmul.mubr.msk.f32.gmra.mxu1 %vm50_vm0, %v1014_v37 }
 0x49b   :  { %v1018_v57 = vpop.permute.xlu1 %1017 }
 0x49c   :  { %v1016_v60 = vpop.permute.xlu0 %1015 }
 0x49d   :  { %1744 = vmatprep.mubr.msk.f32.mxu1 %vm50_vm0, %v1016_v60 }
 0x49e   :  { %1745 = vmatmul.mubr.msk.f32.gmra.mxu1 %vm50_vm0, %v1018_v57 }
 0x49f   :  { %v1022_v61 = vpop.permute.xlu1 %1021 }
 0x4a0   :  { %v1020_v46 = vpop.permute.xlu0 %1019 }
 0x4a1   :  { %1747 = vmatprep.mubr.msk.f32.mxu1 %vm50_vm0, %v1020_v46 }
 0x4a2   :  { %1748 = vmatmul.mubr.msk.f32.gmra.mxu1 %vm50_vm0, %v1022_v61  ;;  %v2502_v61 = vld [vmem:[%s2689_s1 + $0x67] ss:$0 sm:$0xff] }
 0x4aa   :  { %v1728_v27 = vpop.f32.mrf.mxu1 }
 0x4ac   :  { %v1121_v41 = vpop.f32.mrf.mxu1 }
 0x4ad   :  { %v1122_v1 = vadd.f32 %v2502_v61, %v1121_v41 }
 0x4b1   :  { %949 = vadd.xlane.f32.xlu0 %v948_v3  ;;  %v2694_v3 = vld [vmem:[#allocation2_spill] sm:$0xff] }
 0x4b8   :  { %946 = vadd.xlane.f32.xlu1 %v945_v22 }
 0x4c7   :  { %1340 = vrot.lane.b32.xlu0 %v2060_v54, %s1854_s21  ;;  %v958_v54 = vadd.f32 %v2401_v24, %v2338_v12 }
 0x4c9   :  { %1354 = vrot.lane.b32.xlu1 %v2081_v30, %s1854_s21  ;;  %v957_v30 = vadd.f32 %v2401_v24, %v2342_v63 }
 0x4cb   :  { %1344 = vrot.lane.b32.xlu0 %v2068_v62, %s1854_s21  ;;  %v956_v62 = vadd.f32 %v2401_v24, %v2312_v7 }
 0x4cd   :  { %1216 = vrot.lane.b32.xlu1 %v955_v31, %s1855_s24 }
 0x4cf   :  { %1348 = vrot.lane.b32.xlu0 %v2076_v23, %s1854_s21  ;;  %v959_v23 = vadd.f32 %v2401_v24, %v917_v18 }
 0x4d0   :  { %v929_v6 = vpop.xlane.xlu1 %928 }
 0x4d1   :  { %1222 = vrot.lane.b32.xlu1 %v958_v54, %s1855_s24  ;;  %v926_v32 = vpop.xlane.xlu0 %925  ;;  %v963_v0 = vadd.f32 %v2401_v24, %v929_v6 }
 0x4d2   :  { %v962_v5 = vadd.f32 %v2401_v24, %v926_v32 }
 0x4d3   :  { %1352 = vrot.lane.b32.xlu0 %v2085_v39, %s1854_s21  ;;  %v961_v39 = vadd.f32 %v2401_v24, %v923_v29 }
 0x4d4   :  { %v935_v56 = vpop.xlane.xlu1 %934 }
 0x4d5   :  { %1220 = vrot.lane.b32.xlu1 %v957_v30, %s1855_s24  ;;  %v932_v38 = vpop.xlane.xlu0 %931  ;;  %v965_v28 = vadd.f32 %v2401_v24, %v935_v56 }
 0x4d6   :  { %v964_v40 = vadd.f32 %v2401_v24, %v932_v38 }
 0x4d7   :  { %1218 = vrot.lane.b32.xlu0 %v956_v62, %s1855_s24  ;;  %v1127_v62 = vadd.f32 %v1728_v27, %v2502_v61 }
 0x4d8   :  { %v941_v35 = vpop.xlane.xlu1 %940 }
 0x4d9   :  { %1226 = vrot.lane.b32.xlu1 %v960_v36, %s1855_s24  ;;  %v938_v44 = vpop.xlane.xlu0 %937  ;;  %v967_v34 = vadd.f32 %v2401_v24, %v941_v35 }
 0x4da   :  { %v966_v21 = vadd.f32 %v2401_v24, %v938_v44 }
 0x4db   :  { %1224 = vrot.lane.b32.xlu0 %v959_v23, %s1855_s24 }
 0x4dc   :  { %v2443_v51 = vpop.permute.xlu1 %1266 }
 0x4dd   :  { %1230 = vrot.lane.b32.xlu1 %v962_v5, %s1855_s24  ;;  %v944_v26 = vpop.xlane.xlu0 %943 }
 0x4de   :  { %v968_v48 = vadd.f32 %v2401_v24, %v944_v26 }
 0x4df   :  { %1228 = vrot.lane.b32.xlu0 %v961_v39, %s1855_s24 }
 0x4e0   :  { %v2445_v25 = vpop.permute.xlu1 %1270 }
 0x4e1   :  { %1234 = vrot.lane.b32.xlu1 %v964_v40, %s1855_s24  ;;  %v1265_v10 = vpop.permute.xlu0 %1264 }
 0x4e3   :  { %1232 = vrot.lane.b32.xlu0 %v963_v0, %s1855_s24 }
 0x4e4   :  { %v2447_v2 = vpop.permute.xlu1 %1274 }
 0x4e5   :  { %1238 = vrot.lane.b32.xlu1 %v966_v21, %s1855_s24  ;;  %v2449_v42 = vpop.permute.xlu0 %1268 }
 0x4e6   :  { %v1731_v57 = vpop.f32.mrf.mxu1 }
 0x4e7   :  { %1236 = vrot.lane.b32.xlu0 %v965_v28, %s1855_s24  ;;  %v1137_v32 = vadd.f32 %v1731_v57, %v2502_v61 }
 0x4e8   :  { %v2451_v8 = vpop.permute.xlu1 %1278 }
 0x4e9   :  { %1242 = vrot.lane.b32.xlu1 %v968_v48, %s1855_s24  ;;  %v2453_v47 = vpop.permute.xlu0 %1272 }
 0x4eb   :  { %1240 = vrot.lane.b32.xlu0 %v967_v34, %s1855_s24 }
 0x4ec   :  { %v2455_v7 = vpop.permute.xlu1 %1282 }
 0x4ed   :  { %v2457_v53 = vpop.permute.xlu0 %1276 }
 0x4f0   :  { %v2459_v9 = vpop.permute.xlu1 %1286 }
 0x4f1   :  { %v2461_v45 = vpop.permute.xlu0 %1280 }
 0x4f4   :  { %v2463_v11 = vpop.permute.xlu1 %1290 }
 0x4f5   :  { %v2465_v13 = vpop.permute.xlu0 %1284 }
 0x4f8   :  { %v2467_v55 = vpop.permute.xlu1 %1294 }
 0x4f9   :  { %v2469_v15 = vpop.permute.xlu0 %1288 }
 0x4fc   :  { %v1331_v58 = vpop.permute.xlu1 %1330 }
 0x4fd   :  { %v2471_v20 = vpop.permute.xlu0 %1292 }
 0x500   :  { %v1335_v19 = vpop.permute.xlu1 %1334 }
 0x501   :  { %v1329_v14 = vpop.permute.xlu0 %1328 }
 0x504   :  { %v2473_v12 = vpop.permute.xlu1 %1338 }
 0x505   :  { %v2475_v50 = vpop.permute.xlu0 %1332 }
 0x508   :  { %v2477_v63 = vpop.permute.xlu1 %1342 }
 0x509   :  { %v2479_v17 = vpop.permute.xlu0 %1336 }
 0x50c   :  { %v2481_v52 = vpop.permute.xlu1 %1346 }
 0x510   :  { %v2484_v59 = vpop.permute.xlu1 %1350 }
 0x53a   :  { %v950_v16 = vpop.xlane.xlu0 %949 }
 0x53b   :  { %v970_v18 = vadd.f32 %v2401_v24, %v950_v16 }
 0x53d   :  { %1246 = vrot.lane.b32.xlu1 %v970_v18, %s1855_s24 }
 0x53e   :  { %v2487_v33 = vpop.permute.xlu0 %1340 }
 0x541   :  { %v947_v29 = vpop.xlane.xlu1 %946  ;;  %1358 = vrot.lane.b32.xlu1 %v2091_v43, %s1854_s21  ;;  %v1131_v43 = vpop.f32.mrf.mxu1 }
 0x542   :  { %v969_v37 = vadd.f32 %v2401_v24, %v947_v29  ;;  %v2492_v49 = vpop.permute.xlu0 %1344  ;;  %v1132_v56 = vadd.f32 %v2502_v61, %v1131_v43 }
 0x543   :  { %v1734_v22 = vpop.f32.mrf.mxu1 }
 0x544   :  { %1244 = vrot.lane.b32.xlu0 %v969_v37, %s1855_s24  ;;  %v1147_v27 = vadd.f32 %v1734_v22, %v2502_v61 }
 0x545   :  { %v2495_v60 = vpop.permute.xlu1 %1354  ;;  %v1141_v23 = vpop.f32.mrf.mxu1 }
 0x546   :  { %v2497_v46 = vpop.permute.xlu0 %1348  ;;  %v1142_v26 = vadd.f32 %v2502_v61, %v1141_v23 }
 0x548   :  { %1356 = vrot.lane.b32.xlu0 %v2694_v3, %s1854_s21 }
 0x549   :  { %v1217_v4 = vpop.permute.xlu1 %1216 }
 0x54a   :  { %v1376_v24 = vsel %vm50_vm0, %v1122_v1, %v1217_v4  ;;  %v2508_v31 = vpop.permute.xlu0 %1352 }
 0x54b   :  { %v1393_v54 = vsel %vm1392_vm3, %v1376_v24, %v1265_v10 }
 0x54c   :  { %v1410_v30 = vsel %vm1409_vm4, %v1393_v54, %v1329_v14 }
 0x54d   :  { %v1427_v36 = vsel %vm1426_vm5, %v1410_v30, %v1329_v14  ;;  %v1223_v38 = vpop.permute.xlu1 %1222 }
 0x54e   :  { %v1444_v6 = vsel %vm1443_vm6, %v1427_v36, 0.0  ;;  %v1379_v5 = vsel %vm50_vm0, %v1137_v32, %v1223_v38  ;;  %v1219_v39 = vpop.permute.xlu0 %1218 }
 0x54f   :  { %1460 = vst [vmem:[%s2691_s2] sm:$0xff] %v1444_v6  ;;  %v1396_v44 = vsel %vm1392_vm3, %v1379_v5, %v2445_v25  ;;  %v1377_v40 = vsel %vm50_vm0, %v1127_v62, %v1219_v39 }
 0x550   :  { %v1413_v0 = vsel %vm1409_vm4, %v1396_v44, %v1335_v19  ;;  %v1394_v21 = vsel %vm1392_vm3, %v1377_v40, %v2443_v51 }
 0x551   :  { %v1430_v28 = vsel %vm1426_vm5, %v1413_v0, %v1335_v19  ;;  %v1411_v35 = vsel %vm1409_vm4, %v1394_v21, %v1331_v58  ;;  %v1221_v48 = vpop.permute.xlu1 %1220 }
 0x552   :  { %v1447_v34 = vsel %vm1443_vm6, %v1430_v28, 0.0  ;;  %v1428_v25 = vsel %vm1426_vm5, %v1411_v35, %v1331_v58  ;;  %v1378_v10 = vsel %vm50_vm0, %v1132_v56, %v1221_v48  ;;  %v1737_v14 = vpop.f32.mrf.mxu1  ;;  %v1225_v16 = vpop.permute.xlu0 %1224 }
 0x553   :  { %1463 = vst [vmem:[%s2691_s2 + $0x18] sm:$0xff] %v1447_v34  ;;  %v1445_v51 = vsel %vm1443_vm6, %v1428_v25, 0.0  ;;  %v1395_v19 = vsel %vm1392_vm3, %v1378_v10, %v2449_v42  ;;  %v1380_v18 = vsel %vm50_vm0, %v1142_v26, %v1225_v16  ;;  %v1157_v32 = vadd.f32 %v1737_v14, %v2502_v61 }
 0x554   :  { %1461 = vst [vmem:[%s2691_s2 + $0x8] sm:$0xff] %v1445_v51  ;;  %v1412_v58 = vsel %vm1409_vm4, %v1395_v19, %v2475_v50  ;;  %v1397_v29 = vsel %vm1392_vm3, %v1380_v18, %v2453_v47  ;;  %v1151_v41 = vpop.f32.mrf.mxu1 }
 0x555   :  { %v1429_v37 = vsel %vm1426_vm5, %v1412_v58, %v2475_v50  ;;  %v1414_v42 = vsel %vm1409_vm4, %v1397_v29, %v2479_v17  ;;  %v1152_v57 = vadd.f32 %v2502_v61, %v1151_v41  ;;  %v1227_v1 = vpop.permute.xlu1 %1226 }
 0x556   :  { %v1446_v43 = vsel %vm1443_vm6, %v1429_v37, 0.0  ;;  %v1431_v3 = vsel %vm1426_vm5, %v1414_v42, %v2479_v17  ;;  %v1381_v4 = vsel %vm50_vm0, %v1147_v27, %v1227_v1  ;;  %v1740_v22 = vpop.f32.mrf.mxu1  ;;  %v1229_v24 = vpop.permute.xlu0 %1228 }
 0x557   :  { %1462 = vst [vmem:[%s2691_s2 + $0x10] sm:$0xff] %v1446_v43  ;;  %v1448_v47 = vsel %vm1443_vm6, %v1431_v3, 0.0  ;;  %v1398_v50 = vsel %vm1392_vm3, %v1381_v4, %v2447_v2  ;;  %v1382_v54 = vsel %vm50_vm0, %v1152_v57, %v1229_v24  ;;  %v1167_v0 = vadd.f32 %v1740_v22, %v2502_v61 }
 0x558   :  { %1464 = vst [vmem:[%s2691_s2 + $0x20] sm:$0xff] %v1448_v47  ;;  %v1415_v17 = vsel %vm1409_vm4, %v1398_v50, %v2473_v12  ;;  %v1399_v30 = vsel %vm1392_vm3, %v1382_v54, %v2457_v53  ;;  %v1161_v62 = vpop.f32.mrf.mxu1 }
 0x559   :  { %v1432_v36 = vsel %vm1426_vm5, %v1415_v17, %v2473_v12  ;;  %v1416_v2 = vsel %vm1409_vm4, %v1399_v30, %v2487_v33  ;;  %v1162_v38 = vadd.f32 %v2502_v61, %v1161_v62  ;;  %v1231_v23 = vpop.permute.xlu1 %1230 }
 0x55a   :  { %v1449_v6 = vsel %vm1443_vm6, %v1432_v36, 0.0  ;;  %v1433_v5 = vsel %vm1426_vm5, %v1416_v2, %v2487_v33  ;;  %v1383_v39 = vsel %vm50_vm0, %v1157_v32, %v1231_v23  ;;  %v1743_v44 = vpop.f32.mrf.mxu1  ;;  %v1233_v40 = vpop.permute.xlu0 %1232 }
 0x55b   :  { %1465 = vst [vmem:[%s2691_s2 + $0x28] sm:$0xff] %v1449_v6  ;;  %v1450_v53 = vsel %vm1443_vm6, %v1433_v5, 0.0  ;;  %v1400_v12 = vsel %vm1392_vm3, %v1383_v39, %v2451_v8  ;;  %v1384_v56 = vsel %vm50_vm0, %v1162_v38, %v1233_v40  ;;  %v1177_v19 = vadd.f32 %v1743_v44, %v2502_v61 }
 0x55c   :  { %1466 = vst [vmem:[%s2691_s2 + $0x30] sm:$0xff] %v1450_v53  ;;  %v1417_v33 = vsel %vm1409_vm4, %v1400_v12, %v2477_v63  ;;  %v1401_v21 = vsel %vm1392_vm3, %v1384_v56, %v2461_v45  ;;  %v1171_v26 = vpop.f32.mrf.mxu1 }
 0x55d   :  { %v1434_v28 = vsel %vm1426_vm5, %v1417_v33, %v2477_v63  ;;  %v1418_v8 = vsel %vm1409_vm4, %v1401_v21, %v2492_v49  ;;  %v1172_v35 = vadd.f32 %v2502_v61, %v1171_v26  ;;  %v1235_v48 = vpop.permute.xlu1 %1234 }
 0x55e   :  { %v1451_v34 = vsel %vm1443_vm6, %v1434_v28, 0.0  ;;  %v1435_v25 = vsel %vm1426_vm5, %v1418_v8, %v2492_v49  ;;  %v1385_v10 = vsel %vm50_vm0, %v1167_v0, %v1235_v48  ;;  %v1746_v14 = vpop.f32.mrf.mxu1  ;;  %v1237_v16 = vpop.permute.xlu0 %1236 }
 0x55f   :  { %1467 = vst [vmem:[%s2691_s2 + $0x38] sm:$0xff] %v1451_v34  ;;  %v1452_v45 = vsel %vm1443_vm6, %v1435_v25, 0.0  ;;  %v1402_v63 = vsel %vm1392_vm3, %v1385_v10, %v2455_v7  ;;  %v1386_v51 = vsel %vm50_vm0, %v1172_v35, %v1237_v16  ;;  %v1187_v3 = vadd.f32 %v1746_v14, %v2502_v61 }
 0x560   :  { %1468 = vst [vmem:[%s2691_s2 + $0x40] sm:$0xff] %v1452_v45  ;;  %v1419_v49 = vsel %vm1409_vm4, %v1402_v63, %v2481_v52  ;;  %v1403_v18 = vsel %vm1392_vm3, %v1386_v51, %v2465_v13  ;;  %v1181_v27 = vpop.f32.mrf.mxu1 }
 0x561   :  { %v1436_v58 = vsel %vm1426_vm5, %v1419_v49, %v2481_v52  ;;  %v1420_v7 = vsel %vm1409_vm4, %v1403_v18, %v2497_v46  ;;  %v1182_v29 = vadd.f32 %v2502_v61, %v1181_v27  ;;  %v1239_v41 = vpop.permute.xlu1 %1238 }
 0x562   :  { %v1453_v37 = vsel %vm1443_vm6, %v1436_v58, 0.0  ;;  %v1437_v42 = vsel %vm1426_vm5, %v1420_v7, %v2497_v46  ;;  %v1387_v57 = vsel %vm50_vm0, %v1177_v19, %v1239_v41  ;;  %v1241_v1 = vpop.permute.xlu0 %1240  ;;  %v1749_v30 = vpop.f32.mrf.mxu1 }
 0x563   :  { %1469 = vst [vmem:[%s2691_s2 + $0x48] sm:$0xff] %v1453_v37  ;;  %v1454_v13 = vsel %vm1443_vm6, %v1437_v42, 0.0  ;;  %v1404_v52 = vsel %vm1392_vm3, %v1387_v57, %v2459_v9  ;;  %v1388_v43 = vsel %vm50_vm0, %v1182_v29, %v1241_v1  ;;  %v1197_v62 = vadd.f32 %v1749_v30, %v2502_v61 }
 0x564   :  { %1470 = vst [vmem:[%s2691_s2 + $0x50] sm:$0xff] %v1454_v13  ;;  %v1421_v46 = vsel %vm1409_vm4, %v1404_v52, %v2484_v59  ;;  %v1405_v4 = vsel %vm1392_vm3, %v1388_v43, %v2469_v15  ;;  %v1191_v2 = vpop.f32.mrf.mxu1 }
 0x565   :  { %v1438_v22 = vsel %vm1426_vm5, %v1421_v46, %v2484_v59  ;;  %v1422_v9 = vsel %vm1409_vm4, %v1405_v4, %v2508_v31  ;;  %v1243_v24 = vpop.permute.xlu1 %1242 }
 0x566   :  { %v1455_v47 = vsel %vm1443_vm6, %v1438_v22, 0.0  ;;  %v1439_v50 = vsel %vm1426_vm5, %v1422_v9, %v2508_v31  ;;  %v1389_v54 = vsel %vm50_vm0, %v1187_v3, %v1243_v24 }
 0x567   :  { %1471 = vst [vmem:[%s2691_s2 + $0x58] sm:$0xff] %v1455_v47  ;;  %v1456_v15 = vsel %vm1443_vm6, %v1439_v50, 0.0  ;;  %v1406_v59 = vsel %vm1392_vm3, %v1389_v54, %v2463_v11 }
 0x568   :  { %1472 = vst [vmem:[%s2691_s2 + $0x60] sm:$0xff] %v1456_v15  ;;  %v1423_v32 = vsel %vm1409_vm4, %v1406_v59, %v2495_v60 }
 0x569   :  { %v1440_v31 = vsel %vm1426_vm5, %v1423_v32, %v2495_v60  ;;  %v1192_v60 = vadd.f32 %v2502_v61, %v1191_v2 }
 0x56a   :  { %v1457_v17 = vsel %vm1443_vm6, %v1440_v31, 0.0 }
 0x56b   :  { %1473 = vst [vmem:[%s2691_s2 + $0x68] sm:$0xff] %v1457_v17 }
 0x5af   :  { %v1247_v11 = vpop.permute.xlu1 %1246 }
 0x5b0   :  { %v1391_v36 = vsel %vm50_vm0, %v1197_v62, %v1247_v11 }
 0x5b1   :  { %v1408_v38 = vsel %vm1392_vm3, %v1391_v36, %v2467_v55 }
 0x5b3   :  { %v1359_v23 = vpop.permute.xlu1 %1358 }
 0x5b4   :  { %v1425_v6 = vsel %vm1409_vm4, %v1408_v38, %v1359_v23 }
 0x5b5   :  { %v1442_v5 = vsel %vm1426_vm5, %v1425_v6, %v1359_v23 }
 0x5b6   :  { %v1459_v39 = vsel %vm1443_vm6, %v1442_v5, 0.0  ;;  %v1245_v44 = vpop.permute.xlu0 %1244 }
 0x5b7   :  { %1475 = vst [vmem:[%s2691_s2 + $0x78] sm:$0xff] %v1459_v39  ;;  %v1390_v40 = vsel %vm50_vm0, %v1192_v60, %v1245_v44 }
 0x5b8   :  { %v1407_v53 = vsel %vm1392_vm3, %v1390_v40, %v2471_v20 }
 0x5ba   :  { %v1357_v55 = vpop.permute.xlu0 %1356 }
 0x5bb   :  { %v1424_v12 = vsel %vm1409_vm4, %v1407_v53, %v1357_v55 }
 0x5bc   :  { %v1441_v56 = vsel %vm1426_vm5, %v1424_v12, %v1357_v55 }
 0x5bd   :  { %v1458_v61 = vsel %vm1443_vm6, %v1441_v56, 0.0 }
 0x5be   :  { %1474 = vst [vmem:[%s2691_s2 + $0x70] sm:$0xff] %v1458_v61 }

</bundles_post_ra>
